<compile_context>
chip_gen: v7x
topology: tpu7x:2x2x1
jax: 0.10.0
libtpu: 0.0.40
codegen_flags: <defaults>
</compile_context>

<pallas_src>
import math

import jax
import jax.numpy as jnp
import numpy as np
from jax.experimental import pallas as pl
from jax.experimental.pallas import tpu as pltpu

_VMEM_LIMIT = 64 * 1024 * 1024  # fits the physical VMEM of v5e/v6e/v7x


def _round_up(x, m):
    return (x + m - 1) // m * m


def _pad_axis(arr, axis, target):
    """Zero-pad `arr` along `axis` up to length `target` (no-op if already there)."""
    cur = arr.shape[axis]
    if cur == target:
        return arr
    widths = [(0, 0)] * arr.ndim
    widths[axis] = (0, target - cur)
    return jnp.pad(arr, widths)


# ----------------------------------------------------------------------------
# Kernel 1: per-batch adapter weights ("other" source already folded in).
# ----------------------------------------------------------------------------
def _adapter_two_source_kernel(x_ref, dw_ref, db_ref, uw_ref, ub_ref, o_ref):
    x = x_ref[0]                      # (TILE_S, H)
    dw = dw_ref[0]                    # (H, A_pad)  == dw + score_down * dw_other
    uw = uw_ref[0]                    # (A_pad, H)  == uw + score_up   * uw_other

    # down projection + bias + ReLU, all in f32
    h = jnp.dot(x, dw, preferred_element_type=jnp.float32) + db_ref[0]
    h = jnp.maximum(h, 0.0)

    # up projection + bias
    out = jnp.dot(h.astype(uw.dtype), uw,
                  preferred_element_type=jnp.float32) + ub_ref[0]
    o_ref[0] = out.astype(o_ref.dtype)


def adapter_forward_with_params(x, dw, db, uw, ub, dw_other, db_other,
                                uw_other, ub_other, score_down, score_up,
                                *, tile_s=256):
    """Per-batch adapter path. Shapes:
       x:(B,S,H)  dw:(B,H,A)  db:(B,A)  uw:(B,A,H)  ub:(B,H)  (same for *_other)
    """
    B, S, H = x.shape
    A = dw.shape[-1]

    # NOTE: db_other / ub_other are stored by the module but never used in its
    # forward pass, so they are intentionally ignored here (matches PyTorch).
    del db_other, ub_other

    # Fold the scalar-scored "other" source into the primary weights:
    #   x@dw + (x@dwo)*s == x@(dw + s*dwo).  One matmul per projection.
    dw_eff = (dw + score_down * dw_other).astype(dw.dtype)
    uw_eff = (uw + score_up * uw_other).astype(uw.dtype)

    # Pad the adapter dim to a multiple of 128 so the intermediate h is
    # lane-dense (zero pad => exact zeros through ReLU and the up matmul).
    A_pad = _round_up(max(A, 1), 128)
    dw_eff = _pad_axis(dw_eff, -1, A_pad)          # (B, H, A_pad)
    uw_eff = _pad_axis(uw_eff, -2, A_pad)          # (B, A_pad, H)
    db3 = _pad_axis(db.reshape(B, 1, A), -1, A_pad)  # (B, 1, A_pad)
    ub3 = ub.reshape(B, 1, H)                        # (B, 1, H)

    tile_s = min(tile_s, S)
    grid = (B, pl.cdiv(S, tile_s))

    return pl.pallas_call(
        _adapter_two_source_kernel,
        out_shape=jax.ShapeDtypeStruct((B, S, H), x.dtype),
        grid_spec=pltpu.PrefetchScalarGridSpec(
            num_scalar_prefetch=0,
            grid=grid,
            in_specs=[
                pl.BlockSpec((1, tile_s, H), lambda b, s: (b, s, 0)),   # x
                # weights/biases: constant along the s axis -> VMEM-resident
                pl.BlockSpec((1, H, A_pad), lambda b, s: (b, 0, 0)),    # dw_eff
                pl.BlockSpec((1, 1, A_pad), lambda b, s: (b, 0, 0)),    # db
                pl.BlockSpec((1, A_pad, H), lambda b, s: (b, 0, 0)),    # uw_eff
                pl.BlockSpec((1, 1, H), lambda b, s: (b, 0, 0)),        # ub
            ],
            out_specs=pl.BlockSpec((1, tile_s, H), lambda b, s: (b, s, 0)),
        ),
        compiler_params=pltpu.CompilerParams(
            dimension_semantics=("parallel", "parallel"),
            vmem_limit_bytes=_VMEM_LIMIT),
    )(x, dw_eff, db3, uw_eff, ub3)


# ----------------------------------------------------------------------------
# Kernel 2: "manual" path (shared nn.Linear weights) as one big GEMM over B*S.
# ----------------------------------------------------------------------------
def _adapter_manual_kernel(x_ref, wd_ref, bd_ref, wu_ref, bu_ref, o_ref):
    h = jnp.dot(x_ref[...], wd_ref[...],
                preferred_element_type=jnp.float32) + bd_ref[...]
    h = jnp.maximum(h, 0.0)
    out = jnp.dot(h.astype(wu_ref.dtype), wu_ref[...],
                  preferred_element_type=jnp.float32) + bu_ref[...]
    o_ref[...] = out.astype(o_ref.dtype)


def adapter_forward_manual(x, w_down, b_down, w_up, b_up, *, tile_m=256):
    """Manual path. w_down:(H,A) (already transposed from torch (A,H)),
       b_down:(A,), w_up:(A,H), b_up:(H,)."""
    B, S, H = x.shape
    A = w_down.shape[-1]

    A_pad = _round_up(max(A, 1), 128)
    w_down_p = _pad_axis(w_down, -1, A_pad)              # (H, A_pad)
    b_down_p = _pad_axis(b_down.reshape(1, A), -1, A_pad)  # (1, A_pad)
    w_up_p = _pad_axis(w_up, 0, A_pad)                   # (A_pad, H)
    b_up_p = b_up.reshape(1, H)

    # Weights are shared across batch -> collapse batch into one GEMM over M=B*S.
    M = B * S
    x2 = x.reshape(M, H)
    tile_m = min(tile_m, M)
    grid = (pl.cdiv(M, tile_m),)

    out2 = pl.pallas_call(
        _adapter_manual_kernel,
        out_shape=jax.ShapeDtypeStruct((M, H), x.dtype),
        grid_spec=pltpu.PrefetchScalarGridSpec(
            num_scalar_prefetch=0,
            grid=grid,
            in_specs=[
                pl.BlockSpec((tile_m, H), lambda i: (i, 0)),   # x rows
                pl.BlockSpec((H, A_pad), lambda i: (0, 0)),    # w_down (resident)
                pl.BlockSpec((1, A_pad), lambda i: (0, 0)),    # b_down
                pl.BlockSpec((A_pad, H), lambda i: (0, 0)),    # w_up   (resident)
                pl.BlockSpec((1, H), lambda i: (0, 0)),        # b_up
            ],
            out_specs=pl.BlockSpec((tile_m, H), lambda i: (i, 0)),
        ),
        compiler_params=pltpu.CompilerParams(
            dimension_semantics=("parallel",),
            vmem_limit_bytes=_VMEM_LIMIT),
    )(x2, w_down_p, b_down_p, w_up_p, b_up_p)
    return out2.reshape(B, S, H)


# ----------------------------------------------------------------------------
# Deterministic parameter init mirroring the PyTorch __init__.
# ----------------------------------------------------------------------------
def xavier_uniform(key, shape_out_in, gain):
    fan_out, fan_in = shape_out_in
    bound = gain * math.sqrt(6.0 / (fan_in + fan_out))
    return jax.random.uniform(key, shape_out_in, jnp.float32, -bound, bound)


if __name__ == "__main__":
    B, S, H, A = 2, 8, 32, 16   # batch, seq, hidden_size, adapter_dim

    key = jax.random.PRNGKey(0)
    keys = jax.random.split(key, 12)

    x = jax.random.normal(keys[0], (B, S, H), jnp.float32)

    # --- manual-path params (nn.Linear, xavier_uniform gain=1e-4, bias=0) ---
    w_down_t = xavier_uniform(keys[1], (A, H), gain=1e-4)   # torch layout (out,in)
    w_up_t = xavier_uniform(keys[2], (H, A), gain=1e-4)
    b_down = jnp.zeros((A,), jnp.float32)
    b_up = jnp.zeros((H,), jnp.float32)

    # --- applied-adapter-params path (arbitrary hypernetwork outputs) ---
    dw = jax.random.normal(keys[3], (B, H, A), jnp.float32) * 0.05
    db = jax.random.normal(keys[4], (B, A), jnp.float32) * 0.05
    uw = jax.random.normal(keys[5], (B, A, H), jnp.float32) * 0.05
    ub = jax.random.normal(keys[6], (B, H), jnp.float32) * 0.05
    dw_other = jax.random.normal(keys[7], (B, H, A), jnp.float32) * 0.05
    db_other = jax.random.normal(keys[8], (B, A), jnp.float32) * 0.05
    uw_other = jax.random.normal(keys[9], (B, A, H), jnp.float32) * 0.05
    ub_other = jax.random.normal(keys[10], (B, H), jnp.float32) * 0.05
    # score weights are zero-initialized Parameters in the module; use nonzero
    # values here so the "other" branch is actually exercised.
    score_down = jnp.float32(0.3)
    score_up = jnp.float32(0.7)

    # ---------------- run Pallas kernels ----------------
    out_params = adapter_forward_with_params(
        x, dw, db, uw, ub, dw_other, db_other, uw_other, ub_other,
        score_down, score_up)
    out_manual = adapter_forward_manual(
        x, w_down_t.T, b_down, w_up_t.T, b_up)
    jax.block_until_ready((out_params, out_manual))

    # ---------------- pure-JAX references ----------------
    h_ref = jnp.einsum("bsh,bha->bsa", x, dw) + db[:, None, :] \
        + jnp.einsum("bsh,bha->bsa", x, dw_other) * score_down
    h_ref = jnp.maximum(h_ref, 0.0)
    ref_params = jnp.einsum("bsa,bah->bsh", h_ref, uw) + ub[:, None, :] \
        + jnp.einsum("bsa,bah->bsh", h_ref, uw_other) * score_up

    hm = jnp.maximum(x @ w_down_t.T + b_down, 0.0)
    ref_manual = hm @ w_up_t.T + b_up

    assert np.allclose(np.asarray(out_params), np.asarray(ref_params),
                       rtol=5e-2, atol=1e-4), "two-source path mismatch"
    assert np.allclose(np.asarray(out_manual), np.asarray(ref_manual),
                       rtol=5e-2, atol=1e-6), "manual path mismatch"

    print("KERNEL_OK")
</pallas_src>

<mosaic_0001>
module attributes {stable_mosaic.version = 11 : i64} {
  func.func @_adapter_two_source_kernel(%arg0: i32, %arg1: i32, %arg2: memref<1x8x32xf32, #tpu.memory_space<vmem>>, %arg3: memref<1x32x128xf32, #tpu.memory_space<vmem>>, %arg4: memref<1x1x128xf32, #tpu.memory_space<vmem>>, %arg5: memref<1x128x32xf32, #tpu.memory_space<vmem>>, %arg6: memref<1x1x32xf32, #tpu.memory_space<vmem>>, %arg7: memref<1x8x32xf32, #tpu.memory_space<vmem>>) attributes {dimension_semantics = [#tpu.dimension_semantics<parallel>, #tpu.dimension_semantics<parallel>], iteration_bounds = array<i64: 2, 1>, scalar_prefetch = 0 : i64, scratch_operands = 0 : i64, tpu.core_type = #tpu.core_type<tc>, window_params = [{transform_indices = @transform_0, window_bounds = array<i64: 1, 8, 32>}, {transform_indices = @transform_1, window_bounds = array<i64: 1, 32, 128>}, {transform_indices = @transform_2, window_bounds = array<i64: 1, 1, 128>}, {transform_indices = @transform_3, window_bounds = array<i64: 1, 128, 32>}, {transform_indices = @transform_4, window_bounds = array<i64: 1, 1, 32>}, {transform_indices = @transform_5, window_bounds = array<i64: 1, 8, 32>}]} {
    %c0 = arith.constant 0 : index
    %c0_0 = arith.constant 0 : index
    %c0_1 = arith.constant 0 : index
    %0 = vector.load %arg2[%c0, %c0_0, %c0_1] : memref<1x8x32xf32, #tpu.memory_space<vmem>>, vector<1x8x32xf32>
    %1 = vector.shape_cast %0 : vector<1x8x32xf32> to vector<8x32xf32>
    %c0_2 = arith.constant 0 : index
    %c0_3 = arith.constant 0 : index
    %c0_4 = arith.constant 0 : index
    %2 = vector.load %arg3[%c0_2, %c0_3, %c0_4] : memref<1x32x128xf32, #tpu.memory_space<vmem>>, vector<1x32x128xf32>
    %3 = vector.shape_cast %2 : vector<1x32x128xf32> to vector<32x128xf32>
    %c0_5 = arith.constant 0 : index
    %c0_6 = arith.constant 0 : index
    %c0_7 = arith.constant 0 : index
    %4 = vector.load %arg5[%c0_5, %c0_6, %c0_7] : memref<1x128x32xf32, #tpu.memory_space<vmem>>, vector<1x128x32xf32>
    %5 = vector.shape_cast %4 : vector<1x128x32xf32> to vector<128x32xf32>
    %cst = arith.constant dense<0.000000e+00> : vector<8x128xf32>
    %6 = tpu.matmul %1, %3, %cst {dimension_numbers = #tpu.dot_dimension_numbers<[1], [0], [0], [1], [0, 0, 1, 1], [], []>} : vector<8x32xf32>, vector<32x128xf32>, vector<8x128xf32> -> vector<8x128xf32>
    %c0_8 = arith.constant 0 : index
    %c0_9 = arith.constant 0 : index
    %c0_10 = arith.constant 0 : index
    %7 = vector.load %arg4[%c0_8, %c0_9, %c0_10] : memref<1x1x128xf32, #tpu.memory_space<vmem>>, vector<1x1x128xf32>
    %8 = vector.shape_cast %7 : vector<1x1x128xf32> to vector<1x128xf32>
    %9 = vector.broadcast %8 : vector<1x128xf32> to vector<8x128xf32>
    %10 = arith.addf %6, %9 : vector<8x128xf32>
    %cst_11 = arith.constant 0.000000e+00 : f32
    %11 = vector.broadcast %cst_11 : f32 to vector<8x128xf32>
    %12 = arith.maximumf %10, %11 : vector<8x128xf32>
    %cst_12 = arith.constant dense<0.000000e+00> : vector<8x32xf32>
    %13 = tpu.matmul %12, %5, %cst_12 {dimension_numbers = #tpu.dot_dimension_numbers<[1], [0], [0], [1], [0, 0, 1, 1], [], []>} : vector<8x128xf32>, vector<128x32xf32>, vector<8x32xf32> -> vector<8x32xf32>
    %c0_13 = arith.constant 0 : index
    %c0_14 = arith.constant 0 : index
    %c0_15 = arith.constant 0 : index
    %14 = vector.load %arg6[%c0_13, %c0_14, %c0_15] : memref<1x1x32xf32, #tpu.memory_space<vmem>>, vector<1x1x32xf32>
    %15 = vector.shape_cast %14 : vector<1x1x32xf32> to vector<1x32xf32>
    %16 = vector.broadcast %15 : vector<1x32xf32> to vector<8x32xf32>
    %17 = arith.addf %13, %16 : vector<8x32xf32>
    %c0_16 = arith.constant 0 : index
    %c0_17 = arith.constant 0 : index
    %c0_18 = arith.constant 0 : index
    %18 = vector.load %arg7[%c0_16, %c0_17, %c0_18] : memref<1x8x32xf32, #tpu.memory_space<vmem>>, vector<1x8x32xf32>
    %19 = vector.shape_cast %18 : vector<1x8x32xf32> to vector<8x32xf32>
    %20 = vector.shape_cast %17 : vector<8x32xf32> to vector<1x8x32xf32>
    tpu.vector_store %arg7[%c0_16, %c0_17, %c0_18], %20 {strides = array<i32>} : memref<1x8x32xf32, #tpu.memory_space<vmem>>, vector<1x8x32xf32>,
    return
  }
  func.func @transform_0(%arg0: i32, %arg1: i32) -> (i32, i32, i32) {
    %c0_i32 = arith.constant 0 : i32
    %c0_i32_0 = arith.constant 0 : i32
    return %arg0, %arg1, %c0_i32 : i32, i32, i32
  }
  func.func @transform_1(%arg0: i32, %arg1: i32) -> (i32, i32, i32) {
    %c0_i32 = arith.constant 0 : i32
    %c0_i32_0 = arith.constant 0 : i32
    %c0_i32_1 = arith.constant 0 : i32
    return %arg0, %c0_i32, %c0_i32_0 : i32, i32, i32
  }
  func.func @transform_2(%arg0: i32, %arg1: i32) -> (i32, i32, i32) {
    %c0_i32 = arith.constant 0 : i32
    %c0_i32_0 = arith.constant 0 : i32
    %c0_i32_1 = arith.constant 0 : i32
    return %arg0, %c0_i32, %c0_i32_0 : i32, i32, i32
  }
  func.func @transform_3(%arg0: i32, %arg1: i32) -> (i32, i32, i32) {
    %c0_i32 = arith.constant 0 : i32
    %c0_i32_0 = arith.constant 0 : i32
    %c0_i32_1 = arith.constant 0 : i32
    return %arg0, %c0_i32, %c0_i32_0 : i32, i32, i32
  }
  func.func @transform_4(%arg0: i32, %arg1: i32) -> (i32, i32, i32) {
    %c0_i32 = arith.constant 0 : i32
    %c0_i32_0 = arith.constant 0 : i32
    %c0_i32_1 = arith.constant 0 : i32
    return %arg0, %c0_i32, %c0_i32_0 : i32, i32, i32
  }
  func.func @transform_5(%arg0: i32, %arg1: i32) -> (i32, i32, i32) {
    %c0_i32 = arith.constant 0 : i32
    %c0_i32_0 = arith.constant 0 : i32
    return %arg0, %arg1, %c0_i32 : i32, i32, i32
  }
}

</mosaic_0001>

<bundles_post_ra>
// kernel: tpu_custom_call.1
= control target key start
LH: loop header
LB: loop body
LE: loop exit
PB: predicated region body
PF: predicated region fallthrough
CT: control target
= control target key end

     0   :  { %s1594_s0 = inlined_call_operand.hbm [shape: f32[2,8,32], index: 0, kind: input, shape index: {}]   ;;  %s1595_s1 = inlined_call_operand.hbm [shape: f32[2,32,128], index: 1, kind: input, shape index: {}]   ;;  %s1596_s2 = inlined_call_operand.hbm [shape: f32[2,1,128], index: 2, kind: input, shape index: {}]   ;;  %s1597_s3 = inlined_call_operand.hbm [shape: f32[2,128,32], index: 3, kind: input, shape index: {}]   ;;  %s1598_s4 = inlined_call_operand.hbm [shape: f32[2,1,32], index: 4, kind: input, shape index: {}]   ;;  %s1599_s5 = inlined_call_operand.hbm [shape: f32[2,8,32], index: 5, kind: output, shape index: {}]  }
   0x1   :  { %1610 = sst [smem:[#allocation20_spill]] %s1594_s0 }
   0x2   :  { %1611 = sst [smem:[#allocation21_spill]] %s1595_s1 }
   0x3   :  { %1612 = sst [smem:[#allocation22_spill]] %s1597_s3 }
   0x4   :  { %10 = vsyncpa [#allocation3], 0 }
   0x5   :  { %12 = vsyncpa [#allocation3 + $0x1], 0 }
   0x6   :  { %13 = vsyncpa [#allocation6], 0 }
   0x7   :  { %15 = vsyncpa [#allocation6 + $0x1], 0 }
   0x8   :  { %16 = vsyncpa [#allocation9], 0 }
   0x9   :  { %18 = vsyncpa [#allocation9 + $0x1], 0 }
   0xa   :  { %19 = vsyncpa [#allocation4], 0 }
   0xb   :  { %21 = vsyncpa [#allocation4 + $0x1], 0  ;;  %s1251_s18 = smov 0   ;;  %s1253_s19 = smov 0  }
   0xc   :  { %s1255_s20 = smov 0   ;;  %s1257_s21 = smov 0  }
   0xd   :  { %s1259_s22 = smov 0   ;;  %s1261_s23 = smov 0  }
   0xe LB: > { %1613 = sst [smem:[#allocation16_spill]] %s1196_s20  ;;  %s1282_s24 = sadd.s32 4294967295, %s1208_s23   ;;  %s1208_s23 = sphi %s1261_s23, %s27_s23   ;;  %s1204_s22 = sphi %s1259_s22, %s1644_s22   ;;  %s1200_s21 = sphi %s1257_s21, %s1643_s21   ;;  %s1196_s20 = sphi %s1255_s20, %s1639_s20   ;;  %s1192_s19 = sphi %s1253_s19, %s1642_s19   ;;  %s1188_s18 = sphi %s1251_s18, %s1641_s18  }
   0xf   : > { %1614 = sst [smem:[#allocation17_spill]] %s1208_s23  ;;  %s756_s25 = sadd.s32 4294967294, %s1208_s23  }
  0x10   : > { %s39_s26 = sadd.s32 1, %s1204_s22  ;;  %s48_s27 = sadd.s32 1, %s1196_s20 }
  0x11   : > { %p41_p0 = scmp.ge.s32.totalorder %s39_s26, 2  ;;  %p55_p1 = scmp.ne.s32.totalorder %s1196_s20, %s1192_s19 }
  0x12   : > { %p56_p2 = scmp.eq.s32.totalorder %s1208_s23, 0  ;;  %p61_p3 = scmp.ne.s32.totalorder %s1192_s19, %s1188_s18 }
  0x13   : > { %s1646_s26 = smov (%p41_p0, %s39_s26), 0  ;;  %p62_p5 = scmp.eq.s32.totalorder %s1282_s24, 0 }
  0x14   : > { %1615 = sst [smem:[#allocation18_spill]] %s1646_s26  ;;  %p1294_p4 = por %p56_p2, %p55_p1 }
  0x15   : > { %s43_s29 = ssub.s32 %s1204_s22, %s1646_s26  ;;  %p191_p6 = scmp.eq.s32.totalorder %s1282_s24, 1 }
  0x16   : > { %p46_p7 = scmp.eq.s32.totalorder %s43_s29, 0  ;;  %p1302_p8 = por %p62_p5, %p61_p3 }
  0x17   : > { %p1306_p9 = por %p191_p6, %p55_p1  ;;  %p197_p10 = scmp.eq.s32.totalorder %s756_s25, 1 }
  0x18   : > { %s1617_s30 = scalar_select %p1302_p8, 1, 0 }
  0x19   : > { %s1618_s6 = scalar_select %p1306_p9, 1, 0 }
  0x1a   : > { %s1311_s7 = scalar_select %p46_p7, %s1196_s20, %s48_s27  }
  0x1b   : > { %p1313_p11 = por %p197_p10, %p61_p3  ;;  %p913_p13 = scmp.lt.s32.totalorder %s1208_s23, 2 }
  0x1c   : > { %1619 = sst [smem:[#allocation19_spill]] %s1311_s7  ;;  %s1320_s9 = sand.u32 1, %s1196_s20  }
  0x1d   : > { %s1620_s8 = scalar_select %p1313_p11, 1, 0 }
  0x1e   : > { %s1600_s10 = sand.u32 1, %s1208_s23   ;;  %s761_s11 = sshll.u32 %s1320_s9, 5 }
  0x1f   : > { %p1326_p0 = pnand %p913_p13, %p1294_p4  ;;  %s781_s13 = sshll.u32 %s1204_s22, 9 }
  0x20   : > { %s1622_s1 = sld [smem:[#allocation21_spill]]  ;;  %s240_s17 = scalar_lea.vmem [#allocation5], %s761_s11 }
  0x21   : > { %s1621_s12 = scalar_select %p1326_p0, 1, 0 }
  0x22   : > { %s247_s25 = sshll.u32 %s240_s17, 4  ;;  %s1340_s27 = scalar_lea.sflag [#allocation6], %s1600_s10  ;;  %s1336_s25 = int_to_ptr.vmem [resolvable:$true] %s247_s25 }
  0x23   : > { %p1346_p2 = pneg %p1326_p0 }
  0x26   : > { %s1334_s16 = scalar_lea.hbm %s1622_s1, %s781_s13  ;;  %s973_s11 = scalar_lea.hbm %s1622_s1, 1024 }
  0x27   : > { %s968_s28 = scalar_lea.hbm %s1334_s16, 512  ;;  %p974_p5 = scmp.lt.u32.totalorder %s1334_s16, %s1622_s1 }
  0x28   : > { %p969_p1 = scmp.ne.s32.totalorder %s1334_s16, %s968_s28  ;;  %p975_p6 = scmp.lt.u32.totalorder %s973_s11, %s968_s28 }
  0x29   : > { %p977_p10 = scmp.lt.u32.totalorder %s968_s28, %s1334_s16 }
  0x2a   : > { %p971_p3 = pnand %p1346_p2, %p969_p1  ;;  %p976_p7 = por %p975_p6, %p974_p5 }
  0x2c   : > { %p972_p4 = pneg %p971_p3  ;;  %p978_p13 = por %p977_p10, %p976_p7 }
  0x2e   : > { %p979_p12 = pnand %p978_p13, %p972_p4 }
  0x30   : > { %982 = shalt.err (!%p979_p12)
}
  0x31   : > { %s983_s10 = scalar_lea.vmem %s1336_s25, 512  ;;  %s1210_s13 = smov [#allocation5]  }
  0x32   : > { %p984_p1 = scmp.ne.s32.totalorder %s1336_s25, %s983_s10  ;;  %s988_s14 = sshll.u32 %s1210_s13, 4  ;;  %s989_s14 = int_to_ptr.vmem [resolvable:$false] %s988_s14 }
  0x33   : > { %s990_s15 = scalar_lea.vmem %s989_s14, 1024  ;;  %p991_p9 = scmp.lt.s32.totalorder %s1336_s25, %s989_s14 }
  0x34   : > { %p986_p3 = pnand %p984_p1, %p1346_p2  ;;  %p992_p8 = scmp.lt.s32.totalorder %s990_s15, %s983_s10 }
  0x36   : > { %p987_p11 = pneg %p986_p3  ;;  %p993_p5 = por %p992_p8, %p991_p9 }
  0x38   : > { %p994_p6 = pnand %p993_p5, %p987_p11 }
  0x3a   : > { %997 = shalt.err (!%p994_p6)
}
  0x3b   : > { %s1604_s28 = smov 128   ;;  %s1212_s11 = smov 8  }
  0x3c   : > { %899 = dma.hbm_to_vmem [thread:$0]  (!%p1326_p0), %s1334_s16, 512, %s1336_s25, %s1340_s27, %s1604_s28, %s1604_s28, %s1212_s11  }
  0x3d   : > { %p769_p8 = scmp.ge.s32.totalorder %s1208_s23, 1  ;;  %p310_p9 = scmp.lt.s32.totalorder %s1208_s23, 3 }
  0x3e   : > { %s765_s10 = sshll.u32 %s1320_s9, 7  ;;  %s782_s13 = sshll.u32 %s1204_s22, 11 }
  0x3f   : > { %p1376_p11 = pnand %p769_p8, %p310_p9  ;;  %s278_s14 = scalar_lea.vmem [#allocation8], %s765_s10 }
  0x40   : > { %s285_s15 = sshll.u32 %s278_s14, 4  ;;  %s1625_s3 = sld [smem:[#allocation22_spill]]  ;;  %s1386_s15 = int_to_ptr.vmem [resolvable:$true] %s285_s15 }
  0x41   : > { %s1624_s17 = scalar_select %p1376_p11, 1, 0 }
  0x42   : > { %s1626_s16 = sand.u32 1, %s1208_s23  }
  0x43   : > { %s1390_s25 = scalar_lea.sflag [#allocation9], %s1626_s16 }
  0x46   : > { %s1384_s7 = scalar_lea.hbm %s1625_s3, %s782_s13  ;;  %s1003_s1 = scalar_lea.hbm %s1625_s3, 4096 }
  0x47   : > { %s998_s28 = scalar_lea.hbm %s1384_s7, 2048  ;;  %p1004_p10 = scmp.lt.u32.totalorder %s1384_s7, %s1625_s3 }
  0x48   : > { %p999_p12 = scmp.ne.s32.totalorder %s1384_s7, %s998_s28  ;;  %p1005_p13 = scmp.lt.u32.totalorder %s1003_s1, %s998_s28 }
  0x49   : > { %p1007_p3 = scmp.lt.u32.totalorder %s998_s28, %s1384_s7 }
  0x4a   : > { %p1001_p4 = pnand %p999_p12, %p1346_p2  ;;  %p1006_p1 = por %p1005_p13, %p1004_p10 }
  0x4c   : > { %p1002_p7 = pneg %p1001_p4  ;;  %p1008_p5 = por %p1007_p3, %p1006_p1 }
  0x4e   : > { %p1009_p6 = pnand %p1008_p5, %p1002_p7 }
  0x50   : > { %1012 = shalt.err (!%p1009_p6)
}
  0x51   : > { %s1013_s16 = scalar_lea.vmem %s1386_s15, 2048  ;;  %s1213_s10 = smov [#allocation8]  }
  0x52   : > { %p1014_p8 = scmp.ne.s32.totalorder %s1386_s15, %s1013_s16  ;;  %s1018_s14 = sshll.u32 %s1213_s10, 4  ;;  %s1019_s14 = int_to_ptr.vmem [resolvable:$false] %s1018_s14 }
  0x53   : > { %s1020_s26 = scalar_lea.vmem %s1019_s14, 4096  ;;  %p1021_p4 = scmp.lt.s32.totalorder %s1386_s15, %s1019_s14 }
  0x54   : > { %p1016_p9 = pnand %p1014_p8, %p1346_p2  ;;  %p1022_p11 = scmp.lt.s32.totalorder %s1020_s26, %s1013_s16 }
  0x56   : > { %p1017_p12 = pneg %p1016_p9  ;;  %p1023_p10 = por %p1022_p11, %p1021_p4 }
  0x58   : > { %p1024_p13 = pnand %p1023_p10, %p1017_p12 }
  0x5a   : > { %1027 = shalt.err (!%p1024_p13)
}
  0x5b   : > { %s1627_s28 = smov 128   ;;  %s759_s1 = sshll.u32 %s1320_s9, 3 }
  0x5c   : > { %905 = dma.hbm_to_vmem [thread:$0]  (!%p1326_p0), %s1384_s7, 2048, %s1386_s15, %s1390_s25, %s1627_s28, %s1627_s28, %s1212_s11  }
  0x5d   : > { %s760_s13 = sshll.u32 %s1204_s22, 7  ;;  %s1628_s0 = sld [smem:[#allocation20_spill]] }
  0x5e   : > { %s221_s26 = scalar_lea.vmem [#allocation2], %s759_s1  ;;  %s218_s20 = scalar_lea.sflag [#allocation3], %s1320_s9 }
  0x5f   : > { %s229_s3 = sshll.u32 %s221_s26, 4  ;;  %s230_s3 = int_to_ptr.vmem [resolvable:$true] %s229_s3 }
  0x63   : > { %s1422_s14 = scalar_lea.hbm %s1628_s0, %s760_s13  ;;  %s1033_s15 = scalar_lea.hbm %s1628_s0, 256 }
  0x64   : > { %s1028_s23 = scalar_lea.hbm %s1422_s14, 128  ;;  %p1034_p3 = scmp.lt.u32.totalorder %s1422_s14, %s1628_s0 }
  0x65   : > { %p1029_p11 = scmp.ne.s32.totalorder %s1422_s14, %s1028_s23  ;;  %p1035_p5 = scmp.lt.u32.totalorder %s1033_s15, %s1028_s23 }
  0x66   : > { %p1037_p8 = scmp.lt.u32.totalorder %s1028_s23, %s1422_s14 }
  0x67   : > { %p1031_p7 = pnand %p1029_p11, %p1346_p2  ;;  %p1036_p6 = por %p1035_p5, %p1034_p3 }
  0x69   : > { %p1032_p1 = pneg %p1031_p7  ;;  %p1038_p9 = por %p1037_p8, %p1036_p6 }
  0x6b   : > { %p1039_p12 = pnand %p1038_p9, %p1032_p1 }
  0x6d   : > { %1042 = shalt.err (!%p1039_p12)
}
  0x6e   : > { %s1043_s1 = scalar_lea.vmem %s230_s3, 128  ;;  %s1214_s10 = smov [#allocation2]  }
  0x6f   : > { %p1044_p4 = scmp.ne.s32.totalorder %s230_s3, %s1043_s1  ;;  %s1048_s16 = sshll.u32 %s1214_s10, 4  ;;  %s1049_s16 = int_to_ptr.vmem [resolvable:$false] %s1048_s16 }
  0x70   : > { %s1050_s26 = scalar_lea.vmem %s1049_s16, 256  ;;  %p1051_p11 = scmp.lt.s32.totalorder %s230_s3, %s1049_s16 }
  0x71   : > { %p1046_p10 = pnand %p1044_p4, %p1346_p2  ;;  %p1052_p7 = scmp.lt.s32.totalorder %s1050_s26, %s1043_s1 }
  0x73   : > { %p1047_p13 = pneg %p1046_p10  ;;  %p1053_p0 = por %p1052_p7, %p1051_p11 }
  0x75   : > { %p1054_p3 = pnand %p1053_p0, %p1047_p13 }
  0x77   : > { %1057 = shalt.err (!%p1054_p3)
}
  0x78   : > { %p1629_p5 = scmp.ne.s32.totalorder %s1621_s12, 0  ;;  %s764_s23 = sshll.u32 %s1204_s22, 4 }
  0x79   : > { %s260_s7 = scalar_lea.vmem [#allocation7], %s1320_s9  ;;  %s265_s13 = scalar_lea.hbm %s1596_s2, %s764_s23 }
  0x7a   : > { %896 = dma.hbm_to_vmem [thread:$0]  (!%p1629_p5), %s1422_s14, 128, %s230_s3, %s218_s20  }
  0x7b   : > { %s267_s11 = sshll.u32 %s260_s7, 4  ;;  %s1058_s1 = scalar_lea.hbm %s265_s13, 16  ;;  %s268_s11 = int_to_ptr.vmem [resolvable:$true] %s267_s11 }
  0x7c   : > { %p1059_p0 = scmp.ne.s32.totalorder %s265_s13, %s1058_s1  ;;  %s1063_s26 = scalar_lea.hbm %s1596_s2, 32 }
  0x7d   : > { %p1064_p8 = scmp.lt.u32.totalorder %s265_s13, %s1596_s2  ;;  %p1065_p9 = scmp.lt.u32.totalorder %s1063_s26, %s1058_s1 }
  0x7e   : > { %p1061_p1 = pnand %p1059_p0, %p1346_p2  ;;  %p1067_p4 = scmp.lt.u32.totalorder %s1058_s1, %s265_s13 }
  0x7f   : > { %p1066_p12 = por %p1065_p9, %p1064_p8 }
  0x80   : > { %p1062_p6 = pneg %p1061_p1 }
  0x81   : > { %p1068_p10 = por %p1067_p4, %p1066_p12 }
  0x83   : > { %p1069_p13 = pnand %p1068_p10, %p1062_p6 }
  0x85   : > { %1072 = shalt.err (!%p1069_p13)
}
  0x86   : > { %s1073_s20 = scalar_lea.vmem %s268_s11, 16  ;;  %s1215_s14 = smov [#allocation7]  }
  0x87   : > { %p1074_p11 = scmp.ne.s32.totalorder %s268_s11, %s1073_s20  ;;  %s1078_s7 = sshll.u32 %s1215_s14, 4  ;;  %s1079_s7 = int_to_ptr.vmem [resolvable:$false] %s1078_s7 }
  0x88   : > { %s1080_s15 = scalar_lea.vmem %s1079_s7, 32  ;;  %p1081_p0 = scmp.lt.s32.totalorder %s268_s11, %s1079_s7 }
  0x89   : > { %p1076_p7 = pnand %p1074_p11, %p1346_p2  ;;  %p1082_p1 = scmp.lt.s32.totalorder %s1080_s15, %s1073_s20 }
  0x8b   : > { %p1077_p3 = pneg %p1076_p7  ;;  %p1083_p5 = por %p1082_p1, %p1081_p0 }
  0x8d   : > { %p1084_p8 = pnand %p1083_p5, %p1077_p3 }
  0x8f   : > { %1087 = shalt.err (!%p1084_p8)
}
  0x90   : > { %p1630_p9 = scmp.ne.s32.totalorder %s1621_s12, 0  ;;  %s1467_s1 = scalar_lea.hbm %s1598_s4, %s764_s23 }
  0x91   : > { %s298_s10 = scalar_lea.vmem [#allocation10], %s1320_s9  ;;  %s1088_s26 = scalar_lea.hbm %s1467_s1, 16 }
  0x92   : > { %902 = dma.hbm_to_vmem [thread:$0]  (!%p1630_p9), %s265_s13, 16, %s268_s11, %s1340_s27  }
  0x93   : > { %s305_s16 = sshll.u32 %s298_s10, 4  ;;  %p1089_p5 = scmp.ne.s32.totalorder %s1467_s1, %s1088_s26  ;;  %s306_s16 = int_to_ptr.vmem [resolvable:$true] %s305_s16 }
  0x94   : > { %s1093_s11 = scalar_lea.hbm %s1598_s4, 32  ;;  %p1094_p4 = scmp.lt.u32.totalorder %s1467_s1, %s1598_s4 }
  0x95   : > { %p1091_p6 = pnand %p1089_p5, %p1346_p2  ;;  %p1095_p10 = scmp.lt.u32.totalorder %s1093_s11, %s1088_s26 }
  0x96   : > { %p1097_p11 = scmp.lt.u32.totalorder %s1088_s26, %s1467_s1 }
  0x97   : > { %p1092_p12 = pneg %p1091_p6  ;;  %p1096_p13 = por %p1095_p10, %p1094_p4 }
  0x99   : > { %p1098_p7 = por %p1097_p11, %p1096_p13 }
  0x9b   : > { %p1099_p3 = pnand %p1098_p7, %p1092_p12 }
  0x9d   : > { %1102 = shalt.err (!%p1099_p3)
}
  0x9e   : > { %s1103_s9 = scalar_lea.vmem %s306_s16, 16  ;;  %s1216_s23 = smov [#allocation10]  }
  0x9f   : > { %p1104_p0 = scmp.ne.s32.totalorder %s306_s16, %s1103_s9  ;;  %s1108_s14 = sshll.u32 %s1216_s23, 4  ;;  %s1109_s14 = int_to_ptr.vmem [resolvable:$false] %s1108_s14 }
  0xa0   : > { %s1110_s7 = scalar_lea.vmem %s1109_s14, 32  ;;  %p1111_p5 = scmp.lt.s32.totalorder %s306_s16, %s1109_s14 }
  0xa1   : > { %p1106_p1 = pnand %p1104_p0, %p1346_p2  ;;  %p1112_p6 = scmp.lt.s32.totalorder %s1110_s7, %s1103_s9 }
  0xa3   : > { %p1107_p8 = pneg %p1106_p1  ;;  %p1113_p9 = por %p1112_p6, %p1111_p5 }
  0xa5   : > { %p1114_p4 = pnand %p1113_p9, %p1107_p8 }
  0xa7   : > { %1117 = shalt.err (!%p1114_p4)
}
  0xa8   : > { %p1631_p10 = scmp.ne.s32.totalorder %s1621_s12, 0  ;;  %p1632_p12 = scmp.ne.s32.totalorder %s1624_s17, 0 }
  0xa9   : > { %s1491_s29 = sand.u32 (!%p1632_p12), 1, %s1192_s19   ;;  %p1633_p2 = scmp.ne.s32.totalorder (!%p1632_p12), %s1617_s30, 0 }
  0xaa   : > { %908 = dma.hbm_to_vmem [thread:$0]  (!%p1631_p10), %s1467_s1, 16, %s306_s16, %s1390_s25  }
  0xab   : > { %314 = sbr.rel (%p1632_p12) target bundleno = 639 (0x27f), region = 40  ;;  %s770_s15 = sshll.u32 (!%p1632_p12), %s1491_s29, 3 }
  0xac   : > { %s317_s0 = scalar_lea.sflag (!%p1632_p12), [#allocation3], %s1491_s29  ;;  %s1497_s28 = scalar_lea.vmem (!%p1632_p12), [#allocation2], %s770_s15 }
  0xb2   : > { %1171 = dma.done.wait (%p1633_p2), %s317_s0, 128  }
  0xb3   : > { %1173 = vsyncadd (%p1633_p2), %s317_s0, 4294967168  ;;  %s325_s12 = sand.u32 1, %s1282_s24   ;;  %s771_s17 = sshll.u32 %s1491_s29, 5 }
  0xb4   : > { %s326_s25 = scalar_lea.sflag [#allocation6], %s325_s12  ;;  %s329_s1 = scalar_lea.vmem [#allocation5], %s771_s17 }
  0xb5   : > { %1175 = dma.done.wait (%p1633_p2), %s326_s25, 528  }
  0xb6   : > { %1177 = vsyncadd (%p1633_p2), %s326_s25, 4294966768  ;;  %s772_s10 = sshll.u32 %s1491_s29, 7  ;;  %s337_s16 = scalar_lea.vmem [#allocation7], %s1491_s29 }
  0xb7   : > { %s343_s26 = scalar_lea.sflag [#allocation9], %s325_s12  ;;  %s1511_s3 = scalar_lea.vmem [#allocation8], %s772_s10 }
  0xb8   : > { %1179 = dma.done.wait (%p1633_p2), %s343_s26, 2064  }
  0xb9   : > { %1181 = vsyncadd (%p1633_p2), %s343_s26, 4294965232  ;;  %v1217_v0 = vmov 0.0|0.0   ;;  %vm1218_vm0 = vmmov 0   ;;  %v1219_v1 = vmov 0.0   ;;  %v400_v2 = vld [vmem:[%s329_s1] sm:$0xff]  ;;  %v401_v3 = vld [vmem:[%s329_s1 + $0x8] sm:$0xff] }
  0xba   : > { %851 = vmatprep.subr.bf16.mxu0 %v1217_v0  ;;  %813 = vmatprep.mubr.msk.f32.mxu0 %vm1218_vm0, %v1219_v1  ;;  %v402_v4 = vld [vmem:[%s329_s1 + $0x10] sm:$0xff]  ;;  %v852_v5 = vpack.c.bf16 %v401_v3, %v400_v2  ;;  %v403_v6 = vld [vmem:[%s329_s1 + $0x18] sm:$0xff]  ;;  %v404_v7 = vld [vmem:[%s1511_s3] sm:$0xff]  ;;  %vm427_vm1 = vcmask 261120   ;;  %s354_s24 = scalar_lea.vmem [#allocation10], %s1491_s29  ;;  %s778_s30 = sshll.u32 %s1200_s21, 7 }
  0xbb   : > { %857 = vmatprep.subr.bf16.mxu1 %v1217_v0  ;;  %848 = vmatprep.mubr.msk.f32.mxu1 %vm1218_vm0, %v1219_v1  ;;  %v405_v8 = vld [vmem:[%s1511_s3 + $0x8] sm:$0xff]  ;;  %v406_v9 = vld [vmem:[%s1511_s3 + $0x10] sm:$0xff]  ;;  %v407_v10 = vld [vmem:[%s1511_s3 + $0x18] sm:$0xff]  ;;  %v855_v11 = vpack.c.bf16 %v403_v6, %v402_v4  ;;  %s398_s27 = scalar_lea.vmem [#allocation11], %s770_s15  ;;  %s1544_s9 = scalar_lea.hbm %s1599_s5, %s778_s30 }
  0xbc   : > { %853 = vmatpush3.bf16.msra.mxu0 %v852_v5  ;;  %v858_v12 = vpack.c.bf16 %v405_v8, %v404_v7  ;;  %v861_v13 = vpack.c.bf16 %v407_v10, %v406_v9  ;;  %v408_v14 = vld [vmem:[%s1511_s3 + $0x20] sm:$0xff]  ;;  %v409_v15 = vld [vmem:[%s1511_s3 + $0x28] sm:$0xff]  ;;  %v410_v18 = vld [vmem:[%s1511_s3 + $0x30] sm:$0xff]  ;;  %s595_s11 = sshll.u32 %s398_s27, 4  ;;  %s581_s23 = scalar_lea.sflag [#allocation4], %s1491_s29  ;;  %s1546_s11 = int_to_ptr.vmem [resolvable:$true] %s595_s11 }
  0xbd   : > { %854 = vmatprep.subr.bf16.mxu0 %v1217_v0  ;;  %v399_v16 = vld [vmem:[%s1497_s28] sm:$0xff]  ;;  %v864_v17 = vpack.c.bf16 %v409_v15, %v408_v14  ;;  %v412_v21 = vld [vmem:[%s1511_s3 + $0x40] sm:$0xff]  ;;  %s1118_s21 = scalar_lea.vmem %s1546_s11, 128  ;;  %p1634_p13 = scmp.ne.s32.totalorder %s1618_s6, 0 }
  0xbe   : > { %859 = vmatpush3.bf16.msra.mxu1 %v858_v12  ;;  %v411_v19 = vld [vmem:[%s1511_s3 + $0x38] sm:$0xff]  ;;  %v413_v22 = vld [vmem:[%s1511_s3 + $0x48] sm:$0xff]  ;;  %v414_v24 = vld [vmem:[%s1511_s3 + $0x50] sm:$0xff]  ;;  %p1119_p9 = scmp.ne.s32.totalorder %s1546_s11, %s1118_s21  ;;  %s1220_s14 = smov [#allocation11]  }
  0xbf   : > { %860 = vmatprep.subr.bf16.mxu1 %v1217_v0  ;;  %v867_v20 = vpack.c.bf16 %v411_v19, %v410_v18  ;;  %v870_v23 = vpack.c.bf16 %v413_v22, %v412_v21  ;;  %v415_v25 = vld [vmem:[%s1511_s3 + $0x58] sm:$0xff]  ;;  %v416_v27 = vld [vmem:[%s1511_s3 + $0x60] sm:$0xff]  ;;  %v417_v28 = vld [vmem:[%s1511_s3 + $0x68] sm:$0xff]  ;;  %s1122_s7 = sshll.u32 %s1220_s14, 4  ;;  %s1123_s7 = int_to_ptr.vmem [resolvable:$false] %s1122_s7 }
  0xc0   : > { %856 = vmatpush3.bf16.msra.mxu0 %v855_v11  ;;  %v873_v26 = vpack.c.bf16 %v415_v25, %v414_v24  ;;  %v876_v29 = vpack.c.bf16 %v417_v28, %v416_v27  ;;  %v418_v30 = vld [vmem:[%s1511_s3 + $0x70] sm:$0xff]  ;;  %v419_v31 = vld [vmem:[%s1511_s3 + $0x78] sm:$0xff]  ;;  %v774_v33 = vld [vmem:[%s337_s16] ss:$0 sm:$0xff]  ;;  %p1120_p11 = pnand %p1119_p9, %p1634_p13  ;;  %s1124_s15 = scalar_lea.vmem %s1123_s7, 256 }
  0xc1   : > { %v879_v32 = vpack.c.bf16 %v419_v31, %v418_v30  ;;  %v776_v38 = vld [vmem:[%s354_s24] ss:$0 sm:$0xff]  ;;  %p1125_p3 = scmp.lt.s32.totalorder %s1546_s11, %s1123_s7  ;;  %p1126_p0 = scmp.lt.s32.totalorder %s1124_s15, %s1118_s21 }
  0xc2   : > { %862 = vmatpush3.bf16.msra.mxu1 %v861_v13  ;;  %p1121_p7 = pneg %p1120_p11 }
  0xc3   : > { %814 = vmatmul.mubr.msk.f32.vlgmr.msra.gmra.mrb[0].mxu0 %vm427_vm1, %v399_v16  ;;  %863 = vmatprep.subr.bf16.mxu1 %v1217_v0  ;;  %p1127_p1 = por %p1126_p0, %p1125_p3 }
  0xc5   : > { %p1128_p8 = pnand %p1127_p1, %p1121_p7 }
  0xc6   : > { %865 = vmatpush3.bf16.msra.mxu1 %v864_v17 }
  0xc7   : > { %866 = vmatprep.subr.bf16.mxu1 %v1217_v0 }
  0xca   : > { %868 = vmatpush3.bf16.msra.mxu1 %v867_v20 }
  0xcb   : > { %869 = vmatprep.subr.bf16.mxu1 %v1217_v0 }
  0xce   : > { %871 = vmatpush3.bf16.msra.mxu1 %v870_v23 }
  0xcf   : > { %872 = vmatprep.subr.bf16.mxu1 %v1217_v0 }
  0xd2   : > { %874 = vmatpush3.bf16.msra.mxu1 %v873_v26 }
  0xd3   : > { %875 = vmatprep.subr.bf16.mxu1 %v1217_v0 }
  0xd6   : > { %877 = vmatpush3.bf16.msra.mxu1 %v876_v29 }
  0xd7   : > { %878 = vmatprep.subr.bf16.mxu1 %v1217_v0 }
  0xda   : > { %880 = vmatpush3.bf16.msra.mxu1 %v879_v32 }
 0x196   : > { %v497_v34 = vpop.f32.mrb[0].mxu0 }
 0x197   : > { %v498_v35 = vadd.f32 %v774_v33, %v497_v34  ;;  %v815_v36 = vpop.f32.mrb[1].mxu0 }
 0x199   : > { %v501_v37 = vmax.f32 %v498_v35, 0.0 }
 0x19b   : > { %849 = vmatmul.mubr.f32.vlgmr.msra.gmra.mrb[0].mxu1 %v501_v37 }
 0x26e   : > { %v575_v39 = vpop.f32.mrb[0].mxu1 }
 0x26f   : > { %v576_v40 = vadd.f32 %v776_v38, %v575_v39  ;;  %v850_v41 = vpop.f32.mrb[1].mxu1 }
 0x271   : > { %579 = vst.msk [vmem:[%s398_s27] sm:$0xff] %vm427_vm1, %v576_v40 }
 0x272   : > { %1131 = shalt.err (!%p1128_p8)
}
 0x273   : > { %s1132_s29 = scalar_lea.hbm %s1544_s9, 128  ;;  %s1136_s12 = scalar_lea.hbm %s1599_s5, 256 }
 0x274   : > { %p1133_p5 = scmp.ne.s32.totalorder %s1544_s9, %s1132_s29  ;;  %p1137_p10 = scmp.lt.u32.totalorder %s1544_s9, %s1599_s5 }
 0x275   : > { %p1138_p12 = scmp.lt.u32.totalorder %s1136_s12, %s1132_s29  ;;  %p1140_p9 = scmp.lt.u32.totalorder %s1132_s29, %s1544_s9 }
 0x276   : > { %p1134_p6 = pnand %p1133_p5, %p1634_p13 }
 0x277   : > { %p1139_p2 = por %p1138_p12, %p1137_p10 }
 0x278   : > { %p1135_p4 = pneg %p1134_p6 }
 0x279   : > { %p1141_p11 = por %p1140_p9, %p1139_p2 }
 0x27b   : > { %p1142_p7 = pnand %p1141_p11, %p1135_p4 }
 0x27d   : > { %1145 = shalt.err (!%p1142_p7)
}
 0x27e   : > { %891 = dma.vmem_to_hbm [thread:$0]  (%p1634_p13), %s1546_s11, 128, %s1544_s9, %s581_s23  }
 0x27f PF: > { %s1635_s1 = sld [smem:[#allocation17_spill]]  ;;  %s607_s10 = sand.u32 1, %s1188_s18  }
 0x280   : > { %p1636_p3 = scmp.ne.s32.totalorder %s1620_s8, 0  ;;  %s608_s16 = scalar_lea.sflag [#allocation4], %s607_s10 }
 0x285   : > { %p1637_p0 = scmp.ge.s32.totalorder %s1635_s1, 2 }
 0x287   : > { %p910_p1 = pnand %p1637_p0, %p1636_p3 }
 0x289   : > { %1183 = dma.done.wait (!%p910_p1), %s608_s16, 128  }
 0x28a   : > { %1185 = vsyncadd (!%p910_p1), %s608_s16, 4294967168  ;;  %s27_s23 = sadd.s32 1, %s1635_s1   ;;  %s1638_s26 = sld [smem:[#allocation16_spill]] }
 0x28b   : > { %p24_p8 = scmp.ge.s32.totalorder %s27_s23, 4   ;;  %s1639_s20 = sld [smem:[#allocation19_spill]] }
 0x28c   : > { %s1640_s6 = sld [smem:[#allocation18_spill]]  ;;  %s1641_s18 = smov %s1192_s19 }
 0x28d   : > { %s1643_s21 = smov %s1204_s22  ;;  %26 = sbr.rel (!%p24_p8) target bundleno = 14 (0xe), region = 133 }
 0x290   : > { %s1642_s19 = smov %s1638_s26 }
 0x292   : > { %s1644_s22 = smov %s1640_s6 }
 0x294   :  { %613 = vsyncpa [#allocation3], 1 }
 0x295   :  { %615 = vsyncpa [#allocation3 + $0x1], 1 }
 0x296   :  { %616 = vsyncpa [#allocation6], 1 }
 0x297   :  { %618 = vsyncpa [#allocation6 + $0x1], 1 }
 0x298   :  { %619 = vsyncpa [#allocation9], 1 }
 0x299   :  { %621 = vsyncpa [#allocation9 + $0x1], 1 }
 0x29a   :  { %622 = vsyncpa [#allocation4], 1 }
 0x29b   :  { %624 = vsyncpa [#allocation4 + $0x1], 1 }

</bundles_post_ra>
